<compile_context>
chip_gen: v6e
topology: v6e:2x2x1
jax: 0.10.0
libtpu: 0.0.40
codegen_flags: <defaults>
</compile_context>

<pallas_src>
import jax
import jax.numpy as jnp
from jax import lax
from jax.experimental import pallas as pl
from jax.experimental.pallas import tpu as pltpu


def _lstm_recurrence_kernel(pg_ref, whh_ref, h_ref):
    """Full LSTM recurrence over time in a single kernel invocation.

    pg_ref : (T, B, 4H) f32  pre-computed x_t @ W_ih^T + b_ih + b_hh (time-major)
    whh_ref: (H, 4H)    f32  W_hh^T
    h_ref  : (B, H)     f32  hidden state after the last time step
    """
    T, B, H4 = pg_ref.shape
    H = H4 // 4

    whh = whh_ref[...]                       # load once, reuse every step
    h0 = jnp.zeros((B, H), jnp.float32)
    c0 = jnp.zeros((B, H), jnp.float32)

    def step(t, carry):
        h, c = carry
        # Only the recurrent matmul is on the serial critical path.
        gates = pg_ref[t] + jnp.dot(h, whh, preferred_element_type=jnp.float32)
        # Full-width activations over the (B, 4H) vreg: 2 EUP pushes instead
        # of 4 per-gate ones.  Gate order: [i, f, g, o].
        sig = jax.nn.sigmoid(gates)
        th = jnp.tanh(gates)
        i_g = sig[:, 0 * H:1 * H]
        f_g = sig[:, 1 * H:2 * H]
        g_g = th[:, 2 * H:3 * H]
        o_g = sig[:, 3 * H:4 * H]
        c_new = f_g * c + i_g * g_g
        h_new = o_g * jnp.tanh(c_new)
        return (h_new, c_new)

    # Fully-unrolled in-kernel time loop (T is small and static).
    h_last, _ = lax.fori_loop(0, T, step, (h0, c0), unroll=True)
    h_ref[...] = h_last.astype(h_ref.dtype)


def gru_model_forward(seq, w_ih, w_hh, b_ih, b_hh, w_out, b_out):
    """seq: (B, T, I) batch_first (PyTorch convention).  Returns (B, O),
    equal to Linear(LSTM(seq))[: , -1] with zero initial (h, c)."""
    B, T, I = seq.shape
    H = w_hh.shape[1]

    x_tbi = jnp.transpose(seq, (1, 0, 2)).astype(jnp.float32)         # (T, B, I)

    # Hoisted input projection for all time steps: one matmul instead of T
    # tiny MXU pushes inside the recurrent loop.  (bf16 operands would be the
    # right default on v6e/v7x once shapes grow; f32 at toy size.)
    pre_gates = (
        jnp.einsum("tbi,gi->tbg", x_tbi, w_ih,
                   preferred_element_type=jnp.float32)
        + (b_ih + b_hh)[None, None, :]
    )                                                                  # (T, B, 4H)
    whh_t = jnp.transpose(w_hh, (1, 0)).astype(jnp.float32)            # (H, 4H)

    h_last = pl.pallas_call(
        _lstm_recurrence_kernel,
        out_shape=jax.ShapeDtypeStruct((B, H), jnp.float32),
        in_specs=[
            pl.BlockSpec(memory_space=pltpu.MemorySpace.VMEM),  # pre-gates slab
            pl.BlockSpec(memory_space=pltpu.MemorySpace.VMEM),  # W_hh^T
        ],
        out_specs=pl.BlockSpec(memory_space=pltpu.MemorySpace.VMEM),
    )(pre_gates, whh_t)
    # TODO(synk): for large B, add a batch-parallel leading grid axis
    # (dimension_semantics=("parallel", "arbitrary")) so v7x's second
    # TensorCore is used; for large H, tile the 4H axis / use bf16 weights to
    # respect v7x's 64 MiB VMEM.

    # Final projection of the last hidden state: plain XLA matmul (keeping the
    # O=4 output in-kernel would force masked partial stores).
    return (h_last @ w_out.T + b_out).astype(seq.dtype)


def _reference(seq, w_ih, w_hh, b_ih, b_hh, w_out, b_out):
    """Pure-JAX reference matching torch.nn.LSTM (batch_first) + Linear."""
    B, T, I = seq.shape
    H = w_hh.shape[1]

    def step(carry, x_t):
        h, c = carry
        gates = x_t @ w_ih.T + b_ih + h @ w_hh.T + b_hh
        i = jax.nn.sigmoid(gates[:, 0 * H:1 * H])
        f = jax.nn.sigmoid(gates[:, 1 * H:2 * H])
        g = jnp.tanh(gates[:, 2 * H:3 * H])
        o = jax.nn.sigmoid(gates[:, 3 * H:4 * H])
        c = f * c + i * g
        h = o * jnp.tanh(c)
        return (h, c), h

    h0 = jnp.zeros((B, H), jnp.float32)
    c0 = jnp.zeros((B, H), jnp.float32)
    (_, _), hs = lax.scan(step, (h0, c0), jnp.transpose(seq, (1, 0, 2)))
    return hs[-1] @ w_out.T + b_out


if __name__ == "__main__":
    # Small shapes consistent with the module: batch=2, seq=8, input=8,
    # hidden=32, output=4 (single LSTM layer, zero initial hidden state).
    B, T, I, H, O = 2, 8, 8, 32, 4

    key = jax.random.PRNGKey(0)
    ks = jax.random.split(key, 7)
    scale = 1.0 / jnp.sqrt(H)
    seq = jax.random.normal(ks[0], (B, T, I), jnp.float32)
    w_ih = jax.random.uniform(ks[1], (4 * H, I), jnp.float32, -scale, scale)
    w_hh = jax.random.uniform(ks[2], (4 * H, H), jnp.float32, -scale, scale)
    b_ih = jax.random.uniform(ks[3], (4 * H,), jnp.float32, -scale, scale)
    b_hh = jax.random.uniform(ks[4], (4 * H,), jnp.float32, -scale, scale)
    w_out = jax.random.uniform(ks[5], (O, H), jnp.float32, -scale, scale)
    b_out = jax.random.uniform(ks[6], (O,), jnp.float32, -scale, scale)

    fwd = jax.jit(gru_model_forward)
    pred = jax.block_until_ready(fwd(seq, w_ih, w_hh, b_ih, b_hh, w_out, b_out))

    ref = _reference(seq, w_ih, w_hh, b_ih, b_hh, w_out, b_out)
    assert pred.shape == (B, O)
    assert jnp.allclose(pred, ref, atol=1e-5, rtol=1e-5), "mismatch vs reference"

    print("KERNEL_OK")
</pallas_src>

<mosaic_0001>
module attributes {stable_mosaic.version = 11 : i64} {
  func.func @_lstm_recurrence_kernel(%arg0: memref<8x2x128xf32, #tpu.memory_space<vmem>>, %arg1: memref<32x128xf32, #tpu.memory_space<vmem>>, %arg2: memref<2x32xf32, #tpu.memory_space<vmem>>) attributes {dimension_semantics = [], scalar_prefetch = 0 : i64, scratch_operands = 0 : i64, tpu.core_type = #tpu.core_type<tc>} {
    %c0 = arith.constant 0 : index
    %c0_0 = arith.constant 0 : index
    %0 = vector.load %arg1[%c0, %c0_0] : memref<32x128xf32, #tpu.memory_space<vmem>>, vector<32x128xf32>
    %cst = arith.constant 0.000000e+00 : f32
    %1 = vector.broadcast %cst : f32 to vector<2x32xf32>
    %cst_1 = arith.constant 0.000000e+00 : f32
    %2 = vector.broadcast %cst_1 : f32 to vector<2x32xf32>
    %c0_i32 = arith.constant 0 : i32
    %3 = arith.index_cast %c0_i32 : i32 to index
    %c0_2 = arith.constant 0 : index
    %c0_3 = arith.constant 0 : index
    %4 = vector.load %arg0[%3, %c0_2, %c0_3] : memref<8x2x128xf32, #tpu.memory_space<vmem>>, vector<1x2x128xf32>
    %5 = vector.shape_cast %4 : vector<1x2x128xf32> to vector<2x128xf32>
    %cst_4 = arith.constant dense<0.000000e+00> : vector<2x128xf32>
    %6 = tpu.matmul %1, %0, %cst_4 {dimension_numbers = #tpu.dot_dimension_numbers<[1], [0], [0], [1], [0, 0, 1, 1], [], []>} : vector<2x32xf32>, vector<32x128xf32>, vector<2x128xf32> -> vector<2x128xf32>
    %7 = arith.addf %5, %6 : vector<2x128xf32>
    %8 = arith.negf %7 : vector<2x128xf32>
    %9 = math.exp %8 : vector<2x128xf32>
    %cst_5 = arith.constant 1.000000e+00 : f32
    %10 = vector.broadcast %cst_5 : f32 to vector<2x128xf32>
    %11 = arith.addf %10, %9 : vector<2x128xf32>
    %12 = arith.divf %10, %11 : vector<2x128xf32>
    %13 = math.tanh %7 : vector<2x128xf32>
    %14 = vector.extract_strided_slice %12 {offsets = [0, 0], sizes = [2, 32], strides = [1, 1]} : vector<2x128xf32> to vector<2x32xf32>
    %15 = vector.extract_strided_slice %12 {offsets = [0, 32], sizes = [2, 32], strides = [1, 1]} : vector<2x128xf32> to vector<2x32xf32>
    %16 = vector.extract_strided_slice %13 {offsets = [0, 64], sizes = [2, 32], strides = [1, 1]} : vector<2x128xf32> to vector<2x32xf32>
    %17 = vector.extract_strided_slice %12 {offsets = [0, 96], sizes = [2, 32], strides = [1, 1]} : vector<2x128xf32> to vector<2x32xf32>
    %18 = arith.mulf %15, %2 : vector<2x32xf32>
    %19 = arith.mulf %14, %16 : vector<2x32xf32>
    %20 = arith.addf %18, %19 : vector<2x32xf32>
    %21 = math.tanh %20 : vector<2x32xf32>
    %22 = arith.mulf %17, %21 : vector<2x32xf32>
    %c1_i32 = arith.constant 1 : i32
    %23 = arith.index_cast %c1_i32 : i32 to index
    %c0_6 = arith.constant 0 : index
    %c0_7 = arith.constant 0 : index
    %24 = vector.load %arg0[%23, %c0_6, %c0_7] : memref<8x2x128xf32, #tpu.memory_space<vmem>>, vector<1x2x128xf32>
    %25 = vector.shape_cast %24 : vector<1x2x128xf32> to vector<2x128xf32>
    %cst_8 = arith.constant dense<0.000000e+00> : vector<2x128xf32>
    %26 = tpu.matmul %22, %0, %cst_8 {dimension_numbers = #tpu.dot_dimension_numbers<[1], [0], [0], [1], [0, 0, 1, 1], [], []>} : vector<2x32xf32>, vector<32x128xf32>, vector<2x128xf32> -> vector<2x128xf32>
    %27 = arith.addf %25, %26 : vector<2x128xf32>
    %28 = arith.negf %27 : vector<2x128xf32>
    %29 = math.exp %28 : vector<2x128xf32>
    %cst_9 = arith.constant 1.000000e+00 : f32
    %30 = vector.broadcast %cst_9 : f32 to vector<2x128xf32>
    %31 = arith.addf %30, %29 : vector<2x128xf32>
    %32 = arith.divf %30, %31 : vector<2x128xf32>
    %33 = math.tanh %27 : vector<2x128xf32>
    %34 = vector.extract_strided_slice %32 {offsets = [0, 0], sizes = [2, 32], strides = [1, 1]} : vector<2x128xf32> to vector<2x32xf32>
    %35 = vector.extract_strided_slice %32 {offsets = [0, 32], sizes = [2, 32], strides = [1, 1]} : vector<2x128xf32> to vector<2x32xf32>
    %36 = vector.extract_strided_slice %33 {offsets = [0, 64], sizes = [2, 32], strides = [1, 1]} : vector<2x128xf32> to vector<2x32xf32>
    %37 = vector.extract_strided_slice %32 {offsets = [0, 96], sizes = [2, 32], strides = [1, 1]} : vector<2x128xf32> to vector<2x32xf32>
    %38 = arith.mulf %35, %20 : vector<2x32xf32>
    %39 = arith.mulf %34, %36 : vector<2x32xf32>
    %40 = arith.addf %38, %39 : vector<2x32xf32>
    %41 = math.tanh %40 : vector<2x32xf32>
    %42 = arith.mulf %37, %41 : vector<2x32xf32>
    %c2_i32 = arith.constant 2 : i32
    %43 = arith.index_cast %c2_i32 : i32 to index
    %c0_10 = arith.constant 0 : index
    %c0_11 = arith.constant 0 : index
    %44 = vector.load %arg0[%43, %c0_10, %c0_11] : memref<8x2x128xf32, #tpu.memory_space<vmem>>, vector<1x2x128xf32>
    %45 = vector.shape_cast %44 : vector<1x2x128xf32> to vector<2x128xf32>
    %cst_12 = arith.constant dense<0.000000e+00> : vector<2x128xf32>
    %46 = tpu.matmul %42, %0, %cst_12 {dimension_numbers = #tpu.dot_dimension_numbers<[1], [0], [0], [1], [0, 0, 1, 1], [], []>} : vector<2x32xf32>, vector<32x128xf32>, vector<2x128xf32> -> vector<2x128xf32>
    %47 = arith.addf %45, %46 : vector<2x128xf32>
    %48 = arith.negf %47 : vector<2x128xf32>
    %49 = math.exp %48 : vector<2x128xf32>
    %cst_13 = arith.constant 1.000000e+00 : f32
    %50 = vector.broadcast %cst_13 : f32 to vector<2x128xf32>
    %51 = arith.addf %50, %49 : vector<2x128xf32>
    %52 = arith.divf %50, %51 : vector<2x128xf32>
    %53 = math.tanh %47 : vector<2x128xf32>
    %54 = vector.extract_strided_slice %52 {offsets = [0, 0], sizes = [2, 32], strides = [1, 1]} : vector<2x128xf32> to vector<2x32xf32>
    %55 = vector.extract_strided_slice %52 {offsets = [0, 32], sizes = [2, 32], strides = [1, 1]} : vector<2x128xf32> to vector<2x32xf32>
    %56 = vector.extract_strided_slice %53 {offsets = [0, 64], sizes = [2, 32], strides = [1, 1]} : vector<2x128xf32> to vector<2x32xf32>
    %57 = vector.extract_strided_slice %52 {offsets = [0, 96], sizes = [2, 32], strides = [1, 1]} : vector<2x128xf32> to vector<2x32xf32>
    %58 = arith.mulf %55, %40 : vector<2x32xf32>
    %59 = arith.mulf %54, %56 : vector<2x32xf32>
    %60 = arith.addf %58, %59 : vector<2x32xf32>
    %61 = math.tanh %60 : vector<2x32xf32>
    %62 = arith.mulf %57, %61 : vector<2x32xf32>
    %c3_i32 = arith.constant 3 : i32
    %63 = arith.index_cast %c3_i32 : i32 to index
    %c0_14 = arith.constant 0 : index
    %c0_15 = arith.constant 0 : index
    %64 = vector.load %arg0[%63, %c0_14, %c0_15] : memref<8x2x128xf32, #tpu.memory_space<vmem>>, vector<1x2x128xf32>
    %65 = vector.shape_cast %64 : vector<1x2x128xf32> to vector<2x128xf32>
    %cst_16 = arith.constant dense<0.000000e+00> : vector<2x128xf32>
    %66 = tpu.matmul %62, %0, %cst_16 {dimension_numbers = #tpu.dot_dimension_numbers<[1], [0], [0], [1], [0, 0, 1, 1], [], []>} : vector<2x32xf32>, vector<32x128xf32>, vector<2x128xf32> -> vector<2x128xf32>
    %67 = arith.addf %65, %66 : vector<2x128xf32>
    %68 = arith.negf %67 : vector<2x128xf32>
    %69 = math.exp %68 : vector<2x128xf32>
    %cst_17 = arith.constant 1.000000e+00 : f32
    %70 = vector.broadcast %cst_17 : f32 to vector<2x128xf32>
    %71 = arith.addf %70, %69 : vector<2x128xf32>
    %72 = arith.divf %70, %71 : vector<2x128xf32>
    %73 = math.tanh %67 : vector<2x128xf32>
    %74 = vector.extract_strided_slice %72 {offsets = [0, 0], sizes = [2, 32], strides = [1, 1]} : vector<2x128xf32> to vector<2x32xf32>
    %75 = vector.extract_strided_slice %72 {offsets = [0, 32], sizes = [2, 32], strides = [1, 1]} : vector<2x128xf32> to vector<2x32xf32>
    %76 = vector.extract_strided_slice %73 {offsets = [0, 64], sizes = [2, 32], strides = [1, 1]} : vector<2x128xf32> to vector<2x32xf32>
    %77 = vector.extract_strided_slice %72 {offsets = [0, 96], sizes = [2, 32], strides = [1, 1]} : vector<2x128xf32> to vector<2x32xf32>
    %78 = arith.mulf %75, %60 : vector<2x32xf32>
    %79 = arith.mulf %74, %76 : vector<2x32xf32>
    %80 = arith.addf %78, %79 : vector<2x32xf32>
    %81 = math.tanh %80 : vector<2x32xf32>
    %82 = arith.mulf %77, %81 : vector<2x32xf32>
    %c4_i32 = arith.constant 4 : i32
    %83 = arith.index_cast %c4_i32 : i32 to index
    %c0_18 = arith.constant 0 : index
    %c0_19 = arith.constant 0 : index
    %84 = vector.load %arg0[%83, %c0_18, %c0_19] : memref<8x2x128xf32, #tpu.memory_space<vmem>>, vector<1x2x128xf32>
    %85 = vector.shape_cast %84 : vector<1x2x128xf32> to vector<2x128xf32>
    %cst_20 = arith.constant dense<0.000000e+00> : vector<2x128xf32>
    %86 = tpu.matmul %82, %0, %cst_20 {dimension_numbers = #tpu.dot_dimension_numbers<[1], [0], [0], [1], [0, 0, 1, 1], [], []>} : vector<2x32xf32>, vector<32x128xf32>, vector<2x128xf32> -> vector<2x128xf32>
    %87 = arith.addf %85, %86 : vector<2x128xf32>
    %88 = arith.negf %87 : vector<2x128xf32>
    %89 = math.exp %88 : vector<2x128xf32>
    %cst_21 = arith.constant 1.000000e+00 : f32
    %90 = vector.broadcast %cst_21 : f32 to vector<2x128xf32>
    %91 = arith.addf %90, %89 : vector<2x128xf32>
    %92 = arith.divf %90, %91 : vector<2x128xf32>
    %93 = math.tanh %87 : vector<2x128xf32>
    %94 = vector.extract_strided_slice %92 {offsets = [0, 0], sizes = [2, 32], strides = [1, 1]} : vector<2x128xf32> to vector<2x32xf32>
    %95 = vector.extract_strided_slice %92 {offsets = [0, 32], sizes = [2, 32], strides = [1, 1]} : vector<2x128xf32> to vector<2x32xf32>
    %96 = vector.extract_strided_slice %93 {offsets = [0, 64], sizes = [2, 32], strides = [1, 1]} : vector<2x128xf32> to vector<2x32xf32>
    %97 = vector.extract_strided_slice %92 {offsets = [0, 96], sizes = [2, 32], strides = [1, 1]} : vector<2x128xf32> to vector<2x32xf32>
    %98 = arith.mulf %95, %80 : vector<2x32xf32>
    %99 = arith.mulf %94, %96 : vector<2x32xf32>
    %100 = arith.addf %98, %99 : vector<2x32xf32>
    %101 = math.tanh %100 : vector<2x32xf32>
    %102 = arith.mulf %97, %101 : vector<2x32xf32>
    %c5_i32 = arith.constant 5 : i32
    %103 = arith.index_cast %c5_i32 : i32 to index
    %c0_22 = arith.constant 0 : index
    %c0_23 = arith.constant 0 : index
    %104 = vector.load %arg0[%103, %c0_22, %c0_23] : memref<8x2x128xf32, #tpu.memory_space<vmem>>, vector<1x2x128xf32>
    %105 = vector.shape_cast %104 : vector<1x2x128xf32> to vector<2x128xf32>
    %cst_24 = arith.constant dense<0.000000e+00> : vector<2x128xf32>
    %106 = tpu.matmul %102, %0, %cst_24 {dimension_numbers = #tpu.dot_dimension_numbers<[1], [0], [0], [1], [0, 0, 1, 1], [], []>} : vector<2x32xf32>, vector<32x128xf32>, vector<2x128xf32> -> vector<2x128xf32>
    %107 = arith.addf %105, %106 : vector<2x128xf32>
    %108 = arith.negf %107 : vector<2x128xf32>
    %109 = math.exp %108 : vector<2x128xf32>
    %cst_25 = arith.constant 1.000000e+00 : f32
    %110 = vector.broadcast %cst_25 : f32 to vector<2x128xf32>
    %111 = arith.addf %110, %109 : vector<2x128xf32>
    %112 = arith.divf %110, %111 : vector<2x128xf32>
    %113 = math.tanh %107 : vector<2x128xf32>
    %114 = vector.extract_strided_slice %112 {offsets = [0, 0], sizes = [2, 32], strides = [1, 1]} : vector<2x128xf32> to vector<2x32xf32>
    %115 = vector.extract_strided_slice %112 {offsets = [0, 32], sizes = [2, 32], strides = [1, 1]} : vector<2x128xf32> to vector<2x32xf32>
    %116 = vector.extract_strided_slice %113 {offsets = [0, 64], sizes = [2, 32], strides = [1, 1]} : vector<2x128xf32> to vector<2x32xf32>
    %117 = vector.extract_strided_slice %112 {offsets = [0, 96], sizes = [2, 32], strides = [1, 1]} : vector<2x128xf32> to vector<2x32xf32>
    %118 = arith.mulf %115, %100 : vector<2x32xf32>
    %119 = arith.mulf %114, %116 : vector<2x32xf32>
    %120 = arith.addf %118, %119 : vector<2x32xf32>
    %121 = math.tanh %120 : vector<2x32xf32>
    %122 = arith.mulf %117, %121 : vector<2x32xf32>
    %c6_i32 = arith.constant 6 : i32
    %123 = arith.index_cast %c6_i32 : i32 to index
    %c0_26 = arith.constant 0 : index
    %c0_27 = arith.constant 0 : index
    %124 = vector.load %arg0[%123, %c0_26, %c0_27] : memref<8x2x128xf32, #tpu.memory_space<vmem>>, vector<1x2x128xf32>
    %125 = vector.shape_cast %124 : vector<1x2x128xf32> to vector<2x128xf32>
    %cst_28 = arith.constant dense<0.000000e+00> : vector<2x128xf32>
    %126 = tpu.matmul %122, %0, %cst_28 {dimension_numbers = #tpu.dot_dimension_numbers<[1], [0], [0], [1], [0, 0, 1, 1], [], []>} : vector<2x32xf32>, vector<32x128xf32>, vector<2x128xf32> -> vector<2x128xf32>
    %127 = arith.addf %125, %126 : vector<2x128xf32>
    %128 = arith.negf %127 : vector<2x128xf32>
    %129 = math.exp %128 : vector<2x128xf32>
    %cst_29 = arith.constant 1.000000e+00 : f32
    %130 = vector.broadcast %cst_29 : f32 to vector<2x128xf32>
    %131 = arith.addf %130, %129 : vector<2x128xf32>
    %132 = arith.divf %130, %131 : vector<2x128xf32>
    %133 = math.tanh %127 : vector<2x128xf32>
    %134 = vector.extract_strided_slice %132 {offsets = [0, 0], sizes = [2, 32], strides = [1, 1]} : vector<2x128xf32> to vector<2x32xf32>
    %135 = vector.extract_strided_slice %132 {offsets = [0, 32], sizes = [2, 32], strides = [1, 1]} : vector<2x128xf32> to vector<2x32xf32>
    %136 = vector.extract_strided_slice %133 {offsets = [0, 64], sizes = [2, 32], strides = [1, 1]} : vector<2x128xf32> to vector<2x32xf32>
    %137 = vector.extract_strided_slice %132 {offsets = [0, 96], sizes = [2, 32], strides = [1, 1]} : vector<2x128xf32> to vector<2x32xf32>
    %138 = arith.mulf %135, %120 : vector<2x32xf32>
    %139 = arith.mulf %134, %136 : vector<2x32xf32>
    %140 = arith.addf %138, %139 : vector<2x32xf32>
    %141 = math.tanh %140 : vector<2x32xf32>
    %142 = arith.mulf %137, %141 : vector<2x32xf32>
    %c7_i32 = arith.constant 7 : i32
    %143 = arith.index_cast %c7_i32 : i32 to index
    %c0_30 = arith.constant 0 : index
    %c0_31 = arith.constant 0 : index
    %144 = vector.load %arg0[%143, %c0_30, %c0_31] : memref<8x2x128xf32, #tpu.memory_space<vmem>>, vector<1x2x128xf32>
    %145 = vector.shape_cast %144 : vector<1x2x128xf32> to vector<2x128xf32>
    %cst_32 = arith.constant dense<0.000000e+00> : vector<2x128xf32>
    %146 = tpu.matmul %142, %0, %cst_32 {dimension_numbers = #tpu.dot_dimension_numbers<[1], [0], [0], [1], [0, 0, 1, 1], [], []>} : vector<2x32xf32>, vector<32x128xf32>, vector<2x128xf32> -> vector<2x128xf32>
    %147 = arith.addf %145, %146 : vector<2x128xf32>
    %148 = arith.negf %147 : vector<2x128xf32>
    %149 = math.exp %148 : vector<2x128xf32>
    %cst_33 = arith.constant 1.000000e+00 : f32
    %150 = vector.broadcast %cst_33 : f32 to vector<2x128xf32>
    %151 = arith.addf %150, %149 : vector<2x128xf32>
    %152 = arith.divf %150, %151 : vector<2x128xf32>
    %153 = math.tanh %147 : vector<2x128xf32>
    %154 = vector.extract_strided_slice %152 {offsets = [0, 0], sizes = [2, 32], strides = [1, 1]} : vector<2x128xf32> to vector<2x32xf32>
    %155 = vector.extract_strided_slice %152 {offsets = [0, 32], sizes = [2, 32], strides = [1, 1]} : vector<2x128xf32> to vector<2x32xf32>
    %156 = vector.extract_strided_slice %153 {offsets = [0, 64], sizes = [2, 32], strides = [1, 1]} : vector<2x128xf32> to vector<2x32xf32>
    %157 = vector.extract_strided_slice %152 {offsets = [0, 96], sizes = [2, 32], strides = [1, 1]} : vector<2x128xf32> to vector<2x32xf32>
    %158 = arith.mulf %155, %140 : vector<2x32xf32>
    %159 = arith.mulf %154, %156 : vector<2x32xf32>
    %160 = arith.addf %158, %159 : vector<2x32xf32>
    %161 = math.tanh %160 : vector<2x32xf32>
    %162 = arith.mulf %157, %161 : vector<2x32xf32>
    %c8_i32 = arith.constant 8 : i32
    %c0_34 = arith.constant 0 : index
    %c0_35 = arith.constant 0 : index
    %163 = vector.load %arg2[%c0_34, %c0_35] : memref<2x32xf32, #tpu.memory_space<vmem>>, vector<2x32xf32>
    tpu.vector_store %arg2[%c0_34, %c0_35], %162 {strides = array<i32>} : memref<2x32xf32, #tpu.memory_space<vmem>>, vector<2x32xf32>,
    return
  }
}

</mosaic_0001>

<bundles_post_ra>
// kernel: gru_model_forward.1
= control target key start
LH: loop header
LB: loop body
LE: loop exit
PB: predicated region body
PF: predicated region fallthrough
CT: control target
= control target key end

     0   :  { %v1057_v0 = vmov 0.0   ;;  %vm1058_vm0 = vmmov 0   ;;  %s1059_s18 = smov 64   ;;  %s1060_s19 = smov 32   ;;  %vm16_vm1 = vcmask 261120   ;;  %vm833_vm2 = vcmask 254976   ;;  %s1243_s1 = inlined_call_operand.vmem [shape: f32[32,128], index: 1, kind: input, shape index: {}]   ;;  %s1244_s0 = inlined_call_operand.vmem [shape: f32[8,2,128], index: 0, kind: input, shape index: {}]   ;;  %s1245_s2 = inlined_call_operand.vmem [shape: f32[2,32], index: 2, kind: output, shape index: {}]  }
   0x1   :  { %901 = vmatprep.subr.mxu0 %v1057_v0  ;;  %v1080_v1 = vld [vmem:[%s1243_s1 + $0x18] sm:$0xff]  ;;  %v1085_v2 = vld [vmem:[%s1243_s1 + $0x10] sm:$0xff]  ;;  %909 = vmatprep.mubr.msk.f32.mxu0 %vm1058_vm0, %v1057_v0  ;;  %v1095_v3 = vld [vmem:[%s1243_s1 + $0x8] sm:$0xff] }
   0x2   :  { %902 = vmatpush3.msra.mxu0 %v1080_v1  ;;  %912 = vmatprep.subr.mxu1 %v1057_v0  ;;  %v1104_v4 = vld [vmem:[%s1243_s1] sm:$0xff] }
   0x3   :  { %903 = vmatprep.subr.mxu0 %v1057_v0  ;;  %913 = vmatpush3.msra.mxu1 %v1080_v1  ;;  %v15_v5 = vld [vmem:[%s1244_s0] sm:$0x3]  ;;  %v840_v23 = vld [vmem:[%s1244_s0 + $0x2] sm:$0x3]  ;;  %v843_v41 = vld [vmem:[%s1244_s0 + $0x4] sm:$0x3] }
   0x4   :  { %904 = vmatpush3.msra.mxu0 %v1085_v2  ;;  %914 = vmatprep.subr.mxu1 %v1057_v0  ;;  %v846_v59 = vld [vmem:[%s1244_s0 + $0x6] sm:$0x3] }
   0x5   :  { %905 = vmatprep.subr.mxu0 %v1057_v0  ;;  %915 = vmatpush3.msra.mxu1 %v1085_v2 }
   0x6   :  { %906 = vmatpush3.msra.mxu0 %v1095_v3  ;;  %916 = vmatprep.subr.mxu1 %v1057_v0 }
   0x7   :  { %907 = vmatprep.subr.mxu0 %v1057_v0  ;;  %917 = vmatpush3.msra.mxu1 %v1095_v3 }
   0x8   :  { %908 = vmatpush3.msra.mxu0 %v1104_v4  ;;  %918 = vmatprep.subr.mxu1 %v1057_v0 }
   0x9   :  { %910 = vmatmul.mubr.f32.vlgmr.msra.gmra.mxu0 %v1057_v0  ;;  %919 = vmatpush3.msra.mxu1 %v1104_v4 }
   0xa   :  { %920 = vmatprep.mubr.msk.f32.mxu1 %vm1058_vm0, %v1057_v0  ;;  %923 = vmatprep.subr.mxu0 %v1057_v0 }
   0xb   :  { %924 = vmatpush3.msra.mxu0 %v1080_v1  ;;  %931 = vmatprep.mubr.msk.f32.mxu0 %vm1058_vm0, %v1057_v0 }
   0xc   :  { %925 = vmatprep.subr.mxu0 %v1057_v0  ;;  %934 = vmatprep.subr.mxu1 %v1057_v0 }
   0xd   :  { %926 = vmatpush3.msra.mxu0 %v1085_v2 }
   0xe   :  { %927 = vmatprep.subr.mxu0 %v1057_v0 }
   0xf   :  { %928 = vmatpush3.msra.mxu0 %v1095_v3 }
  0x10   :  { %929 = vmatprep.subr.mxu0 %v1057_v0 }
  0x11   :  { %930 = vmatpush3.msra.mxu0 %v1104_v4 }
  0x12   :  { %945 = vmatprep.subr.mxu0 %v1057_v0 }
  0xc9   :  { %v86_v6 = vpop.f32.mrf.mxu0 }
  0xca   :  { %v90_v7 = vadd.f32 %v86_v6, %v15_v5 }
  0xcb   :  { %v911_v8 = vpop.f32.mrf.mxu0 }
  0xcc   :  { %993 = vtanh.f32 %v90_v7  ;;  %v839_v10 = vmul.f32 -1.442695, %v90_v7 }
  0xce   :  { %995 = vpow2.f32 %v839_v10 }
  0xd9   :  { %v994_v9 = vpop.eup %993 }
  0xda   :  { %100 = vrot.lane.b32.xlu0 %v994_v9, %s1059_s18 }
  0xdb   :  { %v996_v11 = vpop.eup %995 }
  0xdc   :  { %v94_v12 = vadd.f32 1.0, %v996_v11 }
  0xde   :  { %997 = vrcp.f32 %v94_v12 }
  0xeb   :  { %v998_v13 = vpop.eup %997 }
  0xec   :  { %v98_v16 = vmul.f32 0.0, %v998_v13 }
 0x14c   :  { %v101_v14 = vpop.permute.xlu0 %100 }
 0x14d   :  { %v103_v15 = vmul.f32 %v998_v13, %v101_v14 }
 0x14f   :  { %105 = vrot.lane.b32.xlu0 %v103_v15, %s1060_s19 }
 0x1c1   :  { %v106_v17 = vpop.permute.xlu0 %105 }
 0x1c2   :  { %v108_v18 = vadd.f32 %v106_v17, %v98_v16 }
 0x1c4   :  { %999 = vtanh.f32 %v108_v18 }
 0x1d1   :  { %v1000_v19 = vpop.eup %999 }
 0x1d2   :  { %111 = vrot.lane.b32.xlu1 %v1000_v19, %s1059_s18 }
 0x244   :  { %v112_v20 = vpop.permute.xlu1 %111 }
 0x245   :  { %v114_v21 = vmul.f32 %v998_v13, %v112_v20 }
 0x247   :  { %118 = vrot.lane.b32.xlu1 %v114_v21, %s1060_s19 }
 0x2b9   :  { %v119_v22 = vpop.permute.xlu1 %118 }
 0x2ba   :  { %921 = vmatmul.mubr.msk.f32.vlgmr.msra.gmra.mxu1 %vm16_vm1, %v119_v22 }
 0x2bb   :  { %935 = vmatpush3.msra.mxu1 %v1080_v1  ;;  %942 = vmatprep.mubr.msk.f32.mxu1 %vm1058_vm0, %v1057_v0 }
 0x2bc   :  { %936 = vmatprep.subr.mxu1 %v1057_v0 }
 0x2bd   :  { %937 = vmatpush3.msra.mxu1 %v1085_v2 }
 0x2be   :  { %938 = vmatprep.subr.mxu1 %v1057_v0 }
 0x2bf   :  { %939 = vmatpush3.msra.mxu1 %v1095_v3 }
 0x2c0   :  { %940 = vmatprep.subr.mxu1 %v1057_v0 }
 0x2c1   :  { %941 = vmatpush3.msra.mxu1 %v1104_v4 }
 0x2c2   :  { %956 = vmatprep.subr.mxu1 %v1057_v0 }
 0x37a   :  { %v188_v24 = vpop.f32.mrf.mxu1 }
 0x37b   :  { %v192_v25 = vadd.f32 %v840_v23, %v188_v24 }
 0x37c   :  { %v922_v26 = vpop.f32.mrf.mxu1 }
 0x37d   :  { %1001 = vtanh.f32 %v192_v25  ;;  %v842_v28 = vmul.f32 -1.442695, %v192_v25 }
 0x37f   :  { %1003 = vpow2.f32 %v842_v28 }
 0x38a   :  { %v1002_v27 = vpop.eup %1001 }
 0x38b   :  { %202 = vrot.lane.b32.xlu0 %v1002_v27, %s1059_s18 }
 0x38c   :  { %v1004_v29 = vpop.eup %1003 }
 0x38d   :  { %v196_v30 = vadd.f32 1.0, %v1004_v29 }
 0x38f   :  { %1005 = vrcp.f32 %v196_v30 }
 0x39c   :  { %v1006_v31 = vpop.eup %1005 }
 0x39d   :  { %v200_v34 = vmul.f32 %v1006_v31, %v108_v18  ;;  %v849_v18 = vld [vmem:[%s1244_s0 + $0x8] sm:$0x3] }
 0x3fd   :  { %v203_v32 = vpop.permute.xlu0 %202 }
 0x3fe   :  { %v205_v33 = vmul.f32 %v1006_v31, %v203_v32 }
 0x400   :  { %207 = vrot.lane.b32.xlu1 %v205_v33, %s1060_s19 }
 0x472   :  { %v208_v35 = vpop.permute.xlu1 %207 }
 0x473   :  { %v210_v36 = vadd.f32 %v208_v35, %v200_v34 }
 0x475   :  { %1007 = vtanh.f32 %v210_v36 }
 0x482   :  { %v1008_v37 = vpop.eup %1007 }
 0x483   :  { %213 = vrot.lane.b32.xlu0 %v1008_v37, %s1059_s18 }
 0x4f5   :  { %v214_v38 = vpop.permute.xlu0 %213 }
 0x4f6   :  { %v216_v39 = vmul.f32 %v1006_v31, %v214_v38 }
 0x4f8   :  { %220 = vrot.lane.b32.xlu1 %v216_v39, %s1060_s19 }
 0x56a   :  { %v221_v40 = vpop.permute.xlu1 %220 }
 0x56b   :  { %932 = vmatmul.mubr.msk.f32.vlgmr.msra.gmra.mxu0 %vm16_vm1, %v221_v40 }
 0x56c   :  { %946 = vmatpush3.msra.mxu0 %v1080_v1  ;;  %953 = vmatprep.mubr.msk.f32.mxu0 %vm1058_vm0, %v1057_v0 }
 0x56d   :  { %947 = vmatprep.subr.mxu0 %v1057_v0 }
 0x56e   :  { %948 = vmatpush3.msra.mxu0 %v1085_v2 }
 0x56f   :  { %949 = vmatprep.subr.mxu0 %v1057_v0 }
 0x570   :  { %950 = vmatpush3.msra.mxu0 %v1095_v3 }
 0x571   :  { %951 = vmatprep.subr.mxu0 %v1057_v0 }
 0x572   :  { %952 = vmatpush3.msra.mxu0 %v1104_v4 }
 0x573   :  { %967 = vmatprep.subr.mxu0 %v1057_v0 }
 0x62b   :  { %v290_v42 = vpop.f32.mrf.mxu0 }
 0x62c   :  { %v294_v43 = vadd.f32 %v843_v41, %v290_v42 }
 0x62d   :  { %v933_v44 = vpop.f32.mrf.mxu0 }
 0x62e   :  { %1009 = vtanh.f32 %v294_v43  ;;  %v845_v46 = vmul.f32 -1.442695, %v294_v43 }
 0x630   :  { %1011 = vpow2.f32 %v845_v46 }
 0x63b   :  { %v1010_v45 = vpop.eup %1009 }
 0x63c   :  { %304 = vrot.lane.b32.xlu0 %v1010_v45, %s1059_s18 }
 0x63d   :  { %v1012_v47 = vpop.eup %1011 }
 0x63e   :  { %v298_v48 = vadd.f32 1.0, %v1012_v47 }
 0x640   :  { %1013 = vrcp.f32 %v298_v48 }
 0x64d   :  { %v1014_v49 = vpop.eup %1013 }
 0x64e   :  { %v302_v52 = vmul.f32 %v1014_v49, %v210_v36  ;;  %v852_v36 = vld [vmem:[%s1244_s0 + $0xa] sm:$0x3] }
 0x6ae   :  { %v305_v50 = vpop.permute.xlu0 %304 }
 0x6af   :  { %v307_v51 = vmul.f32 %v1014_v49, %v305_v50 }
 0x6b1   :  { %309 = vrot.lane.b32.xlu1 %v307_v51, %s1060_s19 }
 0x723   :  { %v310_v53 = vpop.permute.xlu1 %309 }
 0x724   :  { %v312_v54 = vadd.f32 %v310_v53, %v302_v52 }
 0x726   :  { %1015 = vtanh.f32 %v312_v54 }
 0x733   :  { %v1016_v55 = vpop.eup %1015 }
 0x734   :  { %315 = vrot.lane.b32.xlu0 %v1016_v55, %s1059_s18 }
 0x7a6   :  { %v316_v56 = vpop.permute.xlu0 %315 }
 0x7a7   :  { %v318_v57 = vmul.f32 %v1014_v49, %v316_v56  ;;  %v855_v49 = vld [vmem:[%s1244_s0 + $0xc] sm:$0x3] }
 0x7a9   :  { %322 = vrot.lane.b32.xlu1 %v318_v57, %s1060_s19 }
 0x81b   :  { %v323_v58 = vpop.permute.xlu1 %322 }
 0x81c   :  { %943 = vmatmul.mubr.msk.f32.vlgmr.msra.gmra.mxu1 %vm16_vm1, %v323_v58 }
 0x81d   :  { %957 = vmatpush3.msra.mxu1 %v1080_v1  ;;  %964 = vmatprep.mubr.msk.f32.mxu1 %vm1058_vm0, %v1057_v0 }
 0x81e   :  { %958 = vmatprep.subr.mxu1 %v1057_v0 }
 0x81f   :  { %959 = vmatpush3.msra.mxu1 %v1085_v2 }
 0x820   :  { %960 = vmatprep.subr.mxu1 %v1057_v0 }
 0x821   :  { %961 = vmatpush3.msra.mxu1 %v1095_v3 }
 0x822   :  { %962 = vmatprep.subr.mxu1 %v1057_v0 }
 0x823   :  { %963 = vmatpush3.msra.mxu1 %v1104_v4 }
 0x824   :  { %978 = vmatprep.subr.mxu1 %v1057_v0 }
 0x8dc   :  { %v392_v60 = vpop.f32.mrf.mxu1 }
 0x8dd   :  { %v396_v61 = vadd.f32 %v846_v59, %v392_v60 }
 0x8de   :  { %v944_v62 = vpop.f32.mrf.mxu1 }
 0x8df   :  { %1017 = vtanh.f32 %v396_v61  ;;  %v848_v5 = vmul.f32 -1.442695, %v396_v61 }
 0x8e1   :  { %1019 = vpow2.f32 %v848_v5 }
 0x8ec   :  { %v1018_v63 = vpop.eup %1017 }
 0x8ed   :  { %406 = vrot.lane.b32.xlu0 %v1018_v63, %s1059_s18 }
 0x8ee   :  { %v1020_v6 = vpop.eup %1019 }
 0x8ef   :  { %v400_v7 = vadd.f32 1.0, %v1020_v6 }
 0x8f1   :  { %1021 = vrcp.f32 %v400_v7 }
 0x8fe   :  { %v1022_v8 = vpop.eup %1021 }
 0x8ff   :  { %v404_v11 = vmul.f32 %v1022_v8, %v312_v54 }
 0x95f   :  { %v407_v9 = vpop.permute.xlu0 %406 }
 0x960   :  { %v409_v10 = vmul.f32 %v1022_v8, %v407_v9 }
 0x962   :  { %411 = vrot.lane.b32.xlu1 %v409_v10, %s1060_s19 }
 0x9d4   :  { %v412_v12 = vpop.permute.xlu1 %411 }
 0x9d5   :  { %v414_v13 = vadd.f32 %v412_v12, %v404_v11 }
 0x9d7   :  { %1023 = vtanh.f32 %v414_v13 }
 0x9e4   :  { %v1024_v14 = vpop.eup %1023 }
 0x9e5   :  { %417 = vrot.lane.b32.xlu0 %v1024_v14, %s1059_s18 }
 0xa57   :  { %v418_v15 = vpop.permute.xlu0 %417 }
 0xa58   :  { %v420_v16 = vmul.f32 %v1022_v8, %v418_v15  ;;  %v858_v8 = vld [vmem:[%s1244_s0 + $0xe] sm:$0x3] }
 0xa5a   :  { %424 = vrot.lane.b32.xlu1 %v420_v16, %s1060_s19 }
 0xacc   :  { %v425_v17 = vpop.permute.xlu1 %424 }
 0xacd   :  { %954 = vmatmul.mubr.msk.f32.vlgmr.msra.gmra.mxu0 %vm16_vm1, %v425_v17 }
 0xace   :  { %968 = vmatpush3.msra.mxu0 %v1080_v1  ;;  %975 = vmatprep.mubr.msk.f32.mxu0 %vm1058_vm0, %v1057_v0 }
 0xacf   :  { %969 = vmatprep.subr.mxu0 %v1057_v0 }
 0xad0   :  { %970 = vmatpush3.msra.mxu0 %v1085_v2 }
 0xad1   :  { %971 = vmatprep.subr.mxu0 %v1057_v0 }
 0xad2   :  { %972 = vmatpush3.msra.mxu0 %v1095_v3 }
 0xad3   :  { %973 = vmatprep.subr.mxu0 %v1057_v0 }
 0xad4   :  { %974 = vmatpush3.msra.mxu0 %v1104_v4 }
 0xb8d   :  { %v494_v19 = vpop.f32.mrf.mxu0 }
 0xb8e   :  { %v498_v20 = vadd.f32 %v849_v18, %v494_v19 }
 0xb8f   :  { %v955_v21 = vpop.f32.mrf.mxu0 }
 0xb90   :  { %1025 = vtanh.f32 %v498_v20  ;;  %v851_v23 = vmul.f32 -1.442695, %v498_v20 }
 0xb92   :  { %1027 = vpow2.f32 %v851_v23 }
 0xb9d   :  { %v1026_v22 = vpop.eup %1025 }
 0xb9e   :  { %508 = vrot.lane.b32.xlu0 %v1026_v22, %s1059_s18 }
 0xb9f   :  { %v1028_v24 = vpop.eup %1027 }
 0xba0   :  { %v502_v25 = vadd.f32 1.0, %v1028_v24 }
 0xba2   :  { %1029 = vrcp.f32 %v502_v25 }
 0xbaf   :  { %v1030_v26 = vpop.eup %1029 }
 0xbb0   :  { %v506_v29 = vmul.f32 %v1030_v26, %v414_v13 }
 0xc10   :  { %v509_v27 = vpop.permute.xlu0 %508 }
 0xc11   :  { %v511_v28 = vmul.f32 %v1030_v26, %v509_v27 }
 0xc13   :  { %513 = vrot.lane.b32.xlu1 %v511_v28, %s1060_s19 }
 0xc85   :  { %v514_v30 = vpop.permute.xlu1 %513 }
 0xc86   :  { %v516_v31 = vadd.f32 %v514_v30, %v506_v29 }
 0xc88   :  { %1031 = vtanh.f32 %v516_v31 }
 0xc95   :  { %v1032_v32 = vpop.eup %1031 }
 0xc96   :  { %519 = vrot.lane.b32.xlu0 %v1032_v32, %s1059_s18 }
 0xd08   :  { %v520_v33 = vpop.permute.xlu0 %519 }
 0xd09   :  { %v522_v34 = vmul.f32 %v1030_v26, %v520_v33 }
 0xd0b   :  { %526 = vrot.lane.b32.xlu1 %v522_v34, %s1060_s19 }
 0xd7d   :  { %v527_v35 = vpop.permute.xlu1 %526 }
 0xd7e   :  { %965 = vmatmul.mubr.msk.f32.vlgmr.msra.gmra.mxu1 %vm16_vm1, %v527_v35 }
 0xd7f   :  { %979 = vmatpush3.msra.mxu1 %v1080_v1  ;;  %986 = vmatprep.mubr.msk.f32.mxu1 %vm1058_vm0, %v1057_v0 }
 0xd80   :  { %980 = vmatprep.subr.mxu1 %v1057_v0 }
 0xd81   :  { %981 = vmatpush3.msra.mxu1 %v1085_v2 }
 0xd82   :  { %982 = vmatprep.subr.mxu1 %v1057_v0 }
 0xd83   :  { %983 = vmatpush3.msra.mxu1 %v1095_v3 }
 0xd84   :  { %984 = vmatprep.subr.mxu1 %v1057_v0 }
 0xd85   :  { %985 = vmatpush3.msra.mxu1 %v1104_v4 }
 0xe3e   :  { %v596_v1 = vpop.f32.mrf.mxu1 }
 0xe3f   :  { %v600_v37 = vadd.f32 %v852_v36, %v596_v1 }
 0xe40   :  { %v966_v38 = vpop.f32.mrf.mxu1 }
 0xe41   :  { %1033 = vtanh.f32 %v600_v37  ;;  %v854_v2 = vmul.f32 -1.442695, %v600_v37 }
 0xe43   :  { %1035 = vpow2.f32 %v854_v2 }
 0xe4e   :  { %v1034_v39 = vpop.eup %1033 }
 0xe4f   :  { %610 = vrot.lane.b32.xlu0 %v1034_v39, %s1059_s18 }
 0xe50   :  { %v1036_v40 = vpop.eup %1035 }
 0xe51   :  { %v604_v41 = vadd.f32 1.0, %v1036_v40 }
 0xe53   :  { %1037 = vrcp.f32 %v604_v41 }
 0xe60   :  { %v1038_v3 = vpop.eup %1037 }
 0xe61   :  { %v608_v4 = vmul.f32 %v1038_v3, %v516_v31 }
 0xec1   :  { %v611_v0 = vpop.permute.xlu0 %610 }
 0xec2   :  { %v613_v42 = vmul.f32 %v1038_v3, %v611_v0 }
 0xec4   :  { %615 = vrot.lane.b32.xlu1 %v613_v42, %s1060_s19 }
 0xf36   :  { %v616_v43 = vpop.permute.xlu1 %615 }
 0xf37   :  { %v618_v44 = vadd.f32 %v616_v43, %v608_v4 }
 0xf39   :  { %1039 = vtanh.f32 %v618_v44 }
 0xf46   :  { %v1040_v45 = vpop.eup %1039 }
 0xf47   :  { %621 = vrot.lane.b32.xlu0 %v1040_v45, %s1059_s18 }
 0xfb9   :  { %v622_v46 = vpop.permute.xlu0 %621 }
 0xfba   :  { %v624_v47 = vmul.f32 %v1038_v3, %v622_v46 }
 0xfbc   :  { %628 = vrot.lane.b32.xlu1 %v624_v47, %s1060_s19 }
0x102e   :  { %v629_v48 = vpop.permute.xlu1 %628 }
0x102f   :  { %976 = vmatmul.mubr.msk.f32.vlgmr.msra.gmra.mxu0 %vm16_vm1, %v629_v48 }
0x10ef   :  { %v698_v50 = vpop.f32.mrf.mxu0 }
0x10f0   :  { %v702_v51 = vadd.f32 %v855_v49, %v698_v50 }
0x10f1   :  { %v977_v52 = vpop.f32.mrf.mxu0 }
0x10f2   :  { %1041 = vtanh.f32 %v702_v51  ;;  %v857_v54 = vmul.f32 -1.442695, %v702_v51 }
0x10f4   :  { %1043 = vpow2.f32 %v857_v54 }
0x10ff   :  { %v1042_v53 = vpop.eup %1041 }
0x1100   :  { %712 = vrot.lane.b32.xlu0 %v1042_v53, %s1059_s18 }
0x1101   :  { %v1044_v55 = vpop.eup %1043 }
0x1102   :  { %v706_v56 = vadd.f32 1.0, %v1044_v55 }
0x1104   :  { %1045 = vrcp.f32 %v706_v56 }
0x1111   :  { %v1046_v57 = vpop.eup %1045 }
0x1112   :  { %v710_v60 = vmul.f32 %v1046_v57, %v618_v44 }
0x1172   :  { %v713_v58 = vpop.permute.xlu0 %712 }
0x1173   :  { %v715_v59 = vmul.f32 %v1046_v57, %v713_v58 }
0x1175   :  { %717 = vrot.lane.b32.xlu1 %v715_v59, %s1060_s19 }
0x11e7   :  { %v718_v61 = vpop.permute.xlu1 %717 }
0x11e8   :  { %v720_v62 = vadd.f32 %v718_v61, %v710_v60 }
0x11ea   :  { %1047 = vtanh.f32 %v720_v62 }
0x11f7   :  { %v1048_v63 = vpop.eup %1047 }
0x11f8   :  { %723 = vrot.lane.b32.xlu0 %v1048_v63, %s1059_s18 }
0x126a   :  { %v724_v5 = vpop.permute.xlu0 %723 }
0x126b   :  { %v726_v6 = vmul.f32 %v1046_v57, %v724_v5 }
0x126d   :  { %730 = vrot.lane.b32.xlu1 %v726_v6, %s1060_s19 }
0x12df   :  { %v731_v7 = vpop.permute.xlu1 %730 }
0x12e0   :  { %987 = vmatmul.mubr.msk.f32.vlgmr.msra.gmra.mxu1 %vm16_vm1, %v731_v7 }
0x13a0   :  { %v800_v9 = vpop.f32.mrf.mxu1 }
0x13a1   :  { %v804_v10 = vadd.f32 %v858_v8, %v800_v9 }
0x13a2   :  { %v988_v11 = vpop.f32.mrf.mxu1 }
0x13a3   :  { %1049 = vtanh.f32 %v804_v10  ;;  %v860_v13 = vmul.f32 -1.442695, %v804_v10 }
0x13a5   :  { %1051 = vpow2.f32 %v860_v13 }
0x13b0   :  { %v1050_v12 = vpop.eup %1049 }
0x13b1   :  { %814 = vrot.lane.b32.xlu0 %v1050_v12, %s1059_s18 }
0x13b2   :  { %v1052_v14 = vpop.eup %1051 }
0x13b3   :  { %v808_v15 = vadd.f32 1.0, %v1052_v14 }
0x13b5   :  { %1053 = vrcp.f32 %v808_v15 }
0x13c2   :  { %v1054_v16 = vpop.eup %1053 }
0x13c3   :  { %v812_v19 = vmul.f32 %v1054_v16, %v720_v62 }
0x1423   :  { %v815_v17 = vpop.permute.xlu0 %814 }
0x1424   :  { %v817_v18 = vmul.f32 %v1054_v16, %v815_v17 }
0x1426   :  { %819 = vrot.lane.b32.xlu1 %v817_v18, %s1060_s19 }
0x1498   :  { %v820_v20 = vpop.permute.xlu1 %819 }
0x1499   :  { %v822_v21 = vadd.f32 %v820_v20, %v812_v19 }
0x149b   :  { %1055 = vtanh.f32 %v822_v21 }
0x14a8   :  { %v1056_v22 = vpop.eup %1055 }
0x14a9   :  { %825 = vrot.lane.b32.xlu0 %v1056_v22, %s1059_s18 }
0x151b   :  { %v826_v23 = vpop.permute.xlu0 %825 }
0x151c   :  { %v828_v24 = vmul.f32 %v1054_v16, %v826_v23 }
0x151e   :  { %830 = vrot.lane.b32.xlu1 %v828_v24, %s1060_s19 }
0x1590   :  { %v831_v25 = vpop.permute.xlu1 %830 }
0x1591   :  { %834 = vst.msk [vmem:[%s1245_s2] sm:$0x3] %vm833_vm2, %v831_v25 }

</bundles_post_ra>
